<compile_context>
chip_gen: v5e
topology: v5e:2x2
jax: 0.10.0
libtpu: 0.0.40
codegen_flags: <defaults>
</compile_context>

<pallas_src>
import functools

import jax
import jax.numpy as jnp
from jax import lax
from jax.experimental import pallas as pl
from jax.experimental.pallas import tpu as pltpu

MAX_TORQUE = 2.0
DT = 0.05

# Sublanes per batch tile (each sublane row = 128 batch lanes).
# 512 sublanes = 65536 batch elements = ~1 MiB of packed input per grid step.
DEFAULT_TILE_SUBLANES = 512


def _cdiv(a, b):
    return -(-a // b)


def _round_up(x, m):
    return ((x + m - 1) // m) * m


def _pick_tile_sublanes(S, tile_sublanes):
    """Tile size on the sublane (batch/128) axis.

    Aims for >= ~8 grid steps (megacore sharding on v7x, pipeline depth on
    all generations) while never going below 8 sublanes unless the whole
    batch fits in a single tile (block dim == full array dim is legal).
    """
    ts = min(tile_sublanes, _round_up(_cdiv(S, 8), 8))
    if ts >= S:
        ts = S
    return ts


def _coefs(params):
    """(g, m, l) -> (a, b) with a = dt*3g/(2l), b = dt*3/(m*l^2)."""
    p = jnp.asarray(params, jnp.float32)
    g, m, l = p[0], p[1], p[2]
    a = DT * 1.5 * g / l
    b = DT * 3.0 / (m * l * l)
    return jnp.stack([a, b]).astype(jnp.float32)


def _step(cos_th, sin_th, dth, u_raw, a, b, *, normalize):
    """One pendulum step on dense (ts, 128) tiles. Pure elementwise."""
    u = jnp.clip(u_raw, -MAX_TORQUE, MAX_TORQUE)
    # newdth = dth + dt * (-3g/(2l) * -sin_th + 3u/(m l^2)) = dth + a*sin + b*u
    newdth = dth + a * sin_th + b * u
    delta = newdth * DT                      # newth = th + delta

    if normalize:
        # th = atan2(sin_th, cos_th); only cos/sin(th + delta) are needed, so
        # normalize (cos_th, sin_th) and apply the angle-addition identity.
        # The r2 > 0 guard reproduces atan2(0, 0) == 0 (-> cos=1, sin=0).
        r2 = cos_th * cos_th + sin_th * sin_th
        nonzero = r2 > 0.0
        inv_r = jnp.where(nonzero, lax.rsqrt(jnp.where(nonzero, r2, 1.0)), 0.0)
        c0 = jnp.where(nonzero, cos_th * inv_r, 1.0)
        s0 = jnp.where(nonzero, sin_th * inv_r, 0.0)
    else:
        c0, s0 = cos_th, sin_th

    cd = jnp.cos(delta)
    sd = jnp.sin(delta)
    return c0 * cd - s0 * sd, s0 * cd + c0 * sd, newdth


# ---------------------------------------------------------------------------
# Single-step kernel
# ---------------------------------------------------------------------------

def pendulum_dx_kernel(coef_ref, xu_ref, out_ref, *, normalize=True):
    # coef_ref (SMEM, (2,)): a = dt*3g/(2l), b = dt*3/(m*l^2)
    a = coef_ref[0]
    b = coef_ref[1]

    # xu_ref: (4, ts, 128) -> each row slice is a full-occupancy (ts, 128) tile.
    c, s, nd = _step(xu_ref[0], xu_ref[1], xu_ref[2], xu_ref[3],
                     a, b, normalize=normalize)

    out_ref[0] = c          # cos(newth)
    out_ref[1] = s          # sin(newth)
    out_ref[2] = nd         # newdth


def pendulum_dx_packed(xu, params, *, tile_sublanes=DEFAULT_TILE_SUBLANES,
                       assume_normalized=False):
    """Feature-major entry point (no boundary transposes).

    xu: (4, B) float32, rows = (cos_th, sin_th, dth, u).
    params: (3,) float32 = (g, m, l).
    Returns (3, B) float32, rows = (cos_newth, sin_newth, newdth).

    assume_normalized=True skips the renormalization guard (only safe when
    (cos_th, sin_th) is exactly unit-norm, e.g. the output of a prior step).
    """
    assert xu.ndim == 2 and xu.shape[0] == 4
    B = xu.shape[1]
    xu = jnp.asarray(xu, jnp.float32)
    coefs = _coefs(params)

    # Pad only up to the next multiple of 128 lanes so the (4, B) -> (4, S, 128)
    # reshape is a free, contiguous relabeling. B % 128 == 0 -> no copy at all.
    pad = (-B) % 128
    if pad:
        xu = jnp.pad(xu, ((0, 0), (0, pad)))
    S = (B + pad) // 128
    xu3 = xu.reshape(4, S, 128)

    ts = _pick_tile_sublanes(S, tile_sublanes)
    n_tiles = _cdiv(S, ts)   # ragged last block handled by Pallas masking

    out = pl.pallas_call(
        functools.partial(pendulum_dx_kernel, normalize=not assume_normalized),
        out_shape=jax.ShapeDtypeStruct((3, S, 128), jnp.float32),
        grid=(n_tiles,),
        in_specs=[
            pl.BlockSpec(memory_space=pltpu.MemorySpace.SMEM),   # (a, b)
            pl.BlockSpec((4, ts, 128), lambda i: (0, i, 0)),     # packed (x, u)
        ],
        out_specs=pl.BlockSpec((3, ts, 128), lambda i: (0, i, 0)),
        compiler_params=pltpu.CompilerParams(
            dimension_semantics=("parallel",)),
    )(coefs, xu3)

    out = out.reshape(3, S * 128)
    if pad:
        out = out[:, :B]
    return out


# ---------------------------------------------------------------------------
# Fused multi-step rollout kernel (state resident in VMEM across time)
# ---------------------------------------------------------------------------

def pendulum_rollout_kernel(coef_ref, x0_ref, u_ref, out_ref, st_ref):
    t = pl.program_id(1)
    a = coef_ref[0]
    b = coef_ref[1]

    @pl.when(t == 0)
    def _():
        st_ref[...] = x0_ref[...]

    c, s, nd = _step(st_ref[0], st_ref[1], st_ref[2], u_ref[0],
                     a, b, normalize=True)
    st_ref[0] = c
    st_ref[1] = s
    st_ref[2] = nd

    @pl.when(t == pl.num_programs(1) - 1)
    def _():
        out_ref[...] = st_ref[...]


def pendulum_rollout_packed(x0, us, params, *,
                            tile_sublanes=DEFAULT_TILE_SUBLANES):
    """T-step rollout with the state carried in VMEM (one HBM write at the end).

    x0: (3, B) float32, rows = (cos_th, sin_th, dth).
    us: (T, B) float32 torques (clamped inside the kernel).
    Returns the final state, (3, B) float32.
    """
    x0 = jnp.asarray(x0, jnp.float32)
    us = jnp.asarray(us, jnp.float32)
    assert x0.ndim == 2 and x0.shape[0] == 3
    assert us.ndim == 2 and us.shape[1] == x0.shape[1]
    B = x0.shape[1]
    T = us.shape[0]
    coefs = _coefs(params)

    pad = (-B) % 128
    if pad:
        x0 = jnp.pad(x0, ((0, 0), (0, pad)))
        us = jnp.pad(us, ((0, 0), (0, pad)))
    S = (B + pad) // 128
    x03 = x0.reshape(3, S, 128)
    us3 = us.reshape(T, S, 128)

    ts = _pick_tile_sublanes(S, tile_sublanes)
    n_tiles = _cdiv(S, ts)

    out = pl.pallas_call(
        pendulum_rollout_kernel,
        out_shape=jax.ShapeDtypeStruct((3, S, 128), jnp.float32),
        grid=(n_tiles, T),
        in_specs=[
            pl.BlockSpec(memory_space=pltpu.MemorySpace.SMEM),        # (a, b)
            pl.BlockSpec((3, ts, 128), lambda i, t: (0, i, 0)),       # x0 tile
            pl.BlockSpec((1, ts, 128), lambda i, t: (t, i, 0)),       # u[t] tile
        ],
        out_specs=pl.BlockSpec((3, ts, 128), lambda i, t: (0, i, 0)),
        scratch_shapes=[pltpu.VMEM((3, ts, 128), jnp.float32)],
        compiler_params=pltpu.CompilerParams(
            dimension_semantics=("parallel", "arbitrary")),
    )(coefs, x03, us3)

    out = out.reshape(3, S * 128)
    if pad:
        out = out[:, :B]
    return out


# ---------------------------------------------------------------------------
# PyTorch-layout convenience wrapper + pure-JAX reference
# ---------------------------------------------------------------------------

def pendulum_dx(x, u, params, *, tile_sublanes=DEFAULT_TILE_SUBLANES):
    """JAX/Pallas equivalent of PendulumDx.forward (simple=True).

    PyTorch-compatible wrapper: x (B, 3) or (3,), u (B, 1) or (1,),
    params (3,) = (g, m, l). Returns the next state with x's leading shape.
    NOTE: the (B,4)->(4,B) relayout here is boundary plumbing only; hot paths
    should stay feature-major and call pendulum_dx_packed / the rollout kernel.
    """
    squeeze = x.ndim == 1
    if squeeze:
        x = x[None, :]
        u = u[None, :]
    assert x.ndim == 2 and u.ndim == 2
    assert x.shape[0] == u.shape[0]
    assert x.shape[1] == 3 and u.shape[1] == 1

    xu = jnp.concatenate(
        [jnp.asarray(x, jnp.float32), jnp.asarray(u, jnp.float32)], axis=1
    ).T                                            # (4, B), feature-major
    out = pendulum_dx_packed(xu, params, tile_sublanes=tile_sublanes).T
    if squeeze:
        out = out[0]
    return out


def pendulum_dx_reference(x, u, params):
    """Pure-JAX reference mirroring the PyTorch forward literally."""
    g, m, l = params[0], params[1], params[2]
    u_c = jnp.clip(u, -MAX_TORQUE, MAX_TORQUE)[:, 0]
    cos_th, sin_th, dth = x[:, 0], x[:, 1], x[:, 2]
    th = jnp.arctan2(sin_th, cos_th)
    newdth = dth + DT * (-3.0 * g / (2.0 * l) * (-sin_th) + 3.0 * u_c / (m * l ** 2))
    newth = th + newdth * DT
    return jnp.stack([jnp.cos(newth), jnp.sin(newth), newdth], axis=1)


if __name__ == "__main__":
    key = jax.random.PRNGKey(0)
    k_th, k_dth, k_u, k_us = jax.random.split(key, 4)

    # Deterministic parameters from the module __init__ (simple=True): (g, m, l).
    params = jnp.array([9.81, 1.0, 1.0], dtype=jnp.float32)

    # --- single step, PyTorch-layout wrapper, small batch ---------------------
    B = 8
    th = jax.random.uniform(k_th, (B,), jnp.float32, -jnp.pi, jnp.pi)
    dth = jax.random.uniform(k_dth, (B,), jnp.float32, -2.0, 2.0)
    x = jnp.stack([jnp.cos(th), jnp.sin(th), dth], axis=1)          # (B, 3)
    u = jax.random.uniform(k_u, (B, 1), jnp.float32, -3.0, 3.0)     # exercises clamp

    ref = pendulum_dx_reference(x, u, params)
    out = jax.block_until_ready(pendulum_dx(x, u, params))
    assert out.shape == (B, 3), out.shape
    assert out.dtype == jnp.float32
    assert jnp.allclose(out, ref, atol=1e-5), (out, ref)

    # --- single step, feature-major packed path, batch not a multiple of 128 --
    B2 = 200
    th2 = jax.random.uniform(k_th, (B2,), jnp.float32, -jnp.pi, jnp.pi)
    dth2 = jax.random.uniform(k_dth, (B2,), jnp.float32, -2.0, 2.0)
    u2 = jax.random.uniform(k_u, (B2,), jnp.float32, -3.0, 3.0)
    xu2 = jnp.stack([jnp.cos(th2), jnp.sin(th2), dth2, u2], axis=0)  # (4, B2)
    x2 = jnp.stack([jnp.cos(th2), jnp.sin(th2), dth2], axis=1)
    ref2 = pendulum_dx_reference(x2, u2[:, None], params)

    out2 = jax.block_until_ready(pendulum_dx_packed(xu2, params))
    assert out2.shape == (3, B2), out2.shape
    assert jnp.allclose(out2.T, ref2, atol=1e-5)

    # unit-norm fast path (skips the rsqrt renormalization guard)
    out2f = jax.block_until_ready(
        pendulum_dx_packed(xu2, params, assume_normalized=True))
    assert jnp.allclose(out2f.T, ref2, atol=1e-5)

    # --- fused multi-step rollout (state resident in VMEM across time) --------
    T = 16
    us = jax.random.uniform(k_us, (T, B), jnp.float32, -3.0, 3.0)
    x0_fm = jnp.stack([jnp.cos(th), jnp.sin(th), dth], axis=0)       # (3, B)
    roll = jax.block_until_ready(pendulum_rollout_packed(x0_fm, us, params))
    xr = x
    for t in range(T):
        xr = pendulum_dx_reference(xr, us[t][:, None], params)
    assert roll.shape == (3, B), roll.shape
    assert jnp.allclose(roll.T, xr, atol=5e-4), (roll.T, xr)

    print("KERNEL_OK")
</pallas_src>

<mosaic_0001>
module attributes {stable_mosaic.version = 11 : i64} {
  func.func @pendulum_dx_kernel(%arg0: i32, %arg1: memref<2xf32, #tpu.memory_space<smem>>, %arg2: memref<4x1x128xf32, #tpu.memory_space<vmem>>, %arg3: memref<3x1x128xf32, #tpu.memory_space<vmem>>) attributes {dimension_semantics = [#tpu.dimension_semantics<parallel>], iteration_bounds = array<i64: 1>, scalar_prefetch = 0 : i64, scratch_operands = 0 : i64, tpu.core_type = #tpu.core_type<tc>, window_params = [{transform_indices = @transform_0, window_bounds = array<i64: 2>}, {transform_indices = @transform_1, window_bounds = array<i64: 4, 1, 128>}, {transform_indices = @transform_2, window_bounds = array<i64: 3, 1, 128>}]} {
    %c0 = arith.constant 0 : index
    %0 = memref.load %arg1[%c0] : memref<2xf32, #tpu.memory_space<smem>>
    %c1 = arith.constant 1 : index
    %1 = memref.load %arg1[%c1] : memref<2xf32, #tpu.memory_space<smem>>
    %c0_0 = arith.constant 0 : index
    %c0_1 = arith.constant 0 : index
    %c0_2 = arith.constant 0 : index
    %2 = vector.load %arg2[%c0_0, %c0_1, %c0_2] : memref<4x1x128xf32, #tpu.memory_space<vmem>>, vector<1x1x128xf32>
    %3 = vector.shape_cast %2 : vector<1x1x128xf32> to vector<1x128xf32>
    %c1_3 = arith.constant 1 : index
    %c0_4 = arith.constant 0 : index
    %c0_5 = arith.constant 0 : index
    %4 = vector.load %arg2[%c1_3, %c0_4, %c0_5] : memref<4x1x128xf32, #tpu.memory_space<vmem>>, vector<1x1x128xf32>
    %5 = vector.shape_cast %4 : vector<1x1x128xf32> to vector<1x128xf32>
    %c2 = arith.constant 2 : index
    %c0_6 = arith.constant 0 : index
    %c0_7 = arith.constant 0 : index
    %6 = vector.load %arg2[%c2, %c0_6, %c0_7] : memref<4x1x128xf32, #tpu.memory_space<vmem>>, vector<1x1x128xf32>
    %7 = vector.shape_cast %6 : vector<1x1x128xf32> to vector<1x128xf32>
    %c3 = arith.constant 3 : index
    %c0_8 = arith.constant 0 : index
    %c0_9 = arith.constant 0 : index
    %8 = vector.load %arg2[%c3, %c0_8, %c0_9] : memref<4x1x128xf32, #tpu.memory_space<vmem>>, vector<1x1x128xf32>
    %9 = vector.shape_cast %8 : vector<1x1x128xf32> to vector<1x128xf32>
    %cst = arith.constant -2.000000e+00 : f32
    %cst_10 = arith.constant 2.000000e+00 : f32
    %10 = vector.broadcast %cst : f32 to vector<1x128xf32>
    %11 = arith.maximumf %10, %9 : vector<1x128xf32>
    %12 = vector.broadcast %cst_10 : f32 to vector<1x128xf32>
    %13 = arith.minimumf %12, %11 : vector<1x128xf32>
    %14 = vector.broadcast %0 : f32 to vector<1x128xf32>
    %15 = arith.mulf %14, %5 : vector<1x128xf32>
    %16 = arith.addf %7, %15 : vector<1x128xf32>
    %17 = vector.broadcast %1 : f32 to vector<1x128xf32>
    %18 = arith.mulf %17, %13 : vector<1x128xf32>
    %19 = arith.addf %16, %18 : vector<1x128xf32>
    %cst_11 = arith.constant 5.000000e-02 : f32
    %20 = vector.broadcast %cst_11 : f32 to vector<1x128xf32>
    %21 = arith.mulf %19, %20 : vector<1x128xf32>
    %22 = arith.mulf %3, %3 : vector<1x128xf32>
    %23 = arith.mulf %5, %5 : vector<1x128xf32>
    %24 = arith.addf %22, %23 : vector<1x128xf32>
    %cst_12 = arith.constant 0.000000e+00 : f32
    %25 = vector.broadcast %cst_12 : f32 to vector<1x128xf32>
    %26 = arith.cmpf ogt, %24, %25 : vector<1x128xf32>
    %cst_13 = arith.constant 1.000000e+00 : f32
    %27 = vector.broadcast %cst_13 : f32 to vector<1x128xf32>
    %28 = arith.select %26, %24, %27 : vector<1x128xi1>, vector<1x128xf32>
    %29 = math.rsqrt %28 : vector<1x128xf32>
    %cst_14 = arith.constant 0.000000e+00 : f32
    %30 = vector.broadcast %cst_14 : f32 to vector<1x128xf32>
    %31 = arith.select %26, %29, %30 : vector<1x128xi1>, vector<1x128xf32>
    %32 = arith.mulf %3, %31 : vector<1x128xf32>
    %cst_15 = arith.constant 1.000000e+00 : f32
    %33 = vector.broadcast %cst_15 : f32 to vector<1x128xf32>
    %34 = arith.select %26, %32, %33 : vector<1x128xi1>, vector<1x128xf32>
    %35 = arith.mulf %5, %31 : vector<1x128xf32>
    %cst_16 = arith.constant 0.000000e+00 : f32
    %36 = vector.broadcast %cst_16 : f32 to vector<1x128xf32>
    %37 = arith.select %26, %35, %36 : vector<1x128xi1>, vector<1x128xf32>
    %38 = math.cos %21 : vector<1x128xf32>
    %39 = math.sin %21 : vector<1x128xf32>
    %40 = arith.mulf %34, %38 : vector<1x128xf32>
    %41 = arith.mulf %37, %39 : vector<1x128xf32>
    %42 = arith.subf %40, %41 : vector<1x128xf32>
    %43 = arith.mulf %37, %38 : vector<1x128xf32>
    %44 = arith.mulf %34, %39 : vector<1x128xf32>
    %45 = arith.addf %43, %44 : vector<1x128xf32>
    %c0_17 = arith.constant 0 : index
    %c0_18 = arith.constant 0 : index
    %c0_19 = arith.constant 0 : index
    %46 = vector.load %arg3[%c0_17, %c0_18, %c0_19] : memref<3x1x128xf32, #tpu.memory_space<vmem>>, vector<1x1x128xf32>
    %47 = vector.shape_cast %46 : vector<1x1x128xf32> to vector<1x128xf32>
    %48 = vector.shape_cast %42 : vector<1x128xf32> to vector<1x1x128xf32>
    tpu.vector_store %arg3[%c0_17, %c0_18, %c0_19], %48 {strides = array<i32>} : memref<3x1x128xf32, #tpu.memory_space<vmem>>, vector<1x1x128xf32>,
    %c1_20 = arith.constant 1 : index
    %c0_21 = arith.constant 0 : index
    %c0_22 = arith.constant 0 : index
    %49 = vector.load %arg3[%c1_20, %c0_21, %c0_22] : memref<3x1x128xf32, #tpu.memory_space<vmem>>, vector<1x1x128xf32>
    %50 = vector.shape_cast %49 : vector<1x1x128xf32> to vector<1x128xf32>
    %51 = vector.shape_cast %45 : vector<1x128xf32> to vector<1x1x128xf32>
    tpu.vector_store %arg3[%c1_20, %c0_21, %c0_22], %51 {strides = array<i32>} : memref<3x1x128xf32, #tpu.memory_space<vmem>>, vector<1x1x128xf32>,
    %c2_23 = arith.constant 2 : index
    %c0_24 = arith.constant 0 : index
    %c0_25 = arith.constant 0 : index
    %52 = vector.load %arg3[%c2_23, %c0_24, %c0_25] : memref<3x1x128xf32, #tpu.memory_space<vmem>>, vector<1x1x128xf32>
    %53 = vector.shape_cast %52 : vector<1x1x128xf32> to vector<1x128xf32>
    %54 = vector.shape_cast %19 : vector<1x128xf32> to vector<1x1x128xf32>
    tpu.vector_store %arg3[%c2_23, %c0_24, %c0_25], %54 {strides = array<i32>} : memref<3x1x128xf32, #tpu.memory_space<vmem>>, vector<1x1x128xf32>,
    return
  }
  func.func @transform_0(%arg0: i32) -> i32 {
    %c0_i32 = arith.constant 0 : i32
    %c0_i32_0 = arith.constant 0 : i32
    return %c0_i32 : i32
  }
  func.func @transform_1(%arg0: i32) -> (i32, i32, i32) {
    %c0_i32 = arith.constant 0 : i32
    %c0_i32_0 = arith.constant 0 : i32
    %c0_i32_1 = arith.constant 0 : i32
    return %c0_i32, %arg0, %c0_i32_0 : i32, i32, i32
  }
  func.func @transform_2(%arg0: i32) -> (i32, i32, i32) {
    %c0_i32 = arith.constant 0 : i32
    %c0_i32_0 = arith.constant 0 : i32
    %c0_i32_1 = arith.constant 0 : i32
    return %c0_i32, %arg0, %c0_i32_0 : i32, i32, i32
  }
}

</mosaic_0001>

<bundles_post_ra>
// kernel: tpu_custom_call.1
= control target key start
LH: loop header
LB: loop body
LE: loop exit
PB: predicated region body
PF: predicated region fallthrough
CT: control target
= control target key end

     0   :  { %7 = vsyncpa [#allocation5], 0  ;;  %s618_s0 = inlined_call_operand.hbm [shape: f32[2], index: 0, kind: input, shape index: {}]   ;;  %s619_s1 = inlined_call_operand.hbm [shape: f32[4,1,128], index: 1, kind: input, shape index: {}]   ;;  %s620_s2 = inlined_call_operand.hbm [shape: f32[3,1,128], index: 2, kind: output, shape index: {}]  }
   0x1   :  { %8 = vsyncpa [#allocation3], 0 }
   0x2   :  { %9 = vsyncpa [#allocation4], 0  ;;  %s15_s11 = sshll.u32 %s618_s0, 4  ;;  %s23_s14 = sshll.u32 %s619_s1, 4  ;;  %s16_s11 = int_to_ptr.hbm [resolvable:$true] %s15_s11  ;;  %s24_s14 = int_to_ptr.hbm [resolvable:$true] %s23_s14 }
   0x3   :  { %s507_s15 = smov [#allocation2]   ;;  %s508_s16 = smov [#allocation6]  }
   0x4   :  { %18 = dma.hbm_to_smem %s16_s11, 16, %s507_s15, [#allocation5]  }
   0x5   :  { %s25_s17 = sshll.u32 %s508_s16, 4  ;;  %s509_s18 = smov 16   ;;  %s26_s17 = int_to_ptr.vmem [resolvable:$true] %s25_s17 }
   0x6   :  { %s510_s19 = smov 1  }
   0x7   :  { %31 = dma.hbm_to_vmem [thread:$0]  %s24_s14, 64, %s26_s17, [#allocation3], %s509_s18, %s509_s18, %s510_s19  }
   0x8   :  { %501 = dma.done.wait [#allocation5], 16  }
   0x9   :  { %502 = vsyncadd [#allocation5], 4294967280 }
   0xa   :  { %503 = dma.done.wait [#allocation3], 64  }
   0xb   :  { %504 = vsyncadd [#allocation3], 4294967232 }
   0xc   :  { %40 = sfence }
   0xd   :  { %s41_s0 = sld [smem:[#allocation2]]  ;;  %v49_v0 = vld [vmem:[#allocation6 + $0x3] sm:$0x1]  ;;  %v543_v1 = vld [vmem:[#allocation6 + $0x1] sm:$0x1]  ;;  %s518_s1 = smov [#allocation7]  }
   0xe   :  { %s419_s20 = sld [smem:[#allocation2 + $0x1]]  ;;  %v420_v2 = vclamps-f32 %v49_v0, 2.0  ;;  %v47_v3 = vld [vmem:[#allocation6 + $0x2] sm:$0x1]  ;;  %v511_v22 = vmov 683565275  }
   0xf   :  { %v512_v24 = vmov 2475754826   ;;  %v513_v26 = vmov 2131351028   ;;  %v514_v28 = vmov 2102212464  }
  0x10   :  { %v515_v30 = vmov 920167782   ;;  %v516_v36 = vmov 1326507024   ;;  %s403_s21 = sshll.u32 %s518_s1, 4  ;;  %s405_s24 = sshll.u32 %s620_s2, 4  ;;  %s404_s21 = int_to_ptr.vmem [resolvable:$true] %s403_s21  ;;  %s406_s24 = int_to_ptr.hbm [resolvable:$true] %s405_s24 }
  0x13   :  { %v52_v4 = vstv %s41_s0 }
  0x14   :  { %v53_v5 = vmul.f32 %v52_v4, %v543_v1  ;;  %v55_v6 = vstv %s419_s20 }
  0x15   :  { %v56_v7 = vmul.f32 %v420_v2, %v55_v6 }
  0x16   :  { %v54_v8 = vadd.f32 %v53_v5, %v47_v3 }
  0x18   :  { %v57_v9 = vadd.f32 %v56_v7, %v54_v8 }
  0x1a   :  { %v546_v10 = vmul.f32 0.05, %v57_v9  ;;  %398 = vst [vmem:[#allocation7 + $0x2] sm:$0x1] %v57_v9 }
  0x1c   :  { %v82_v11 = vand.u32 2139095040, %v546_v10  ;;  %v79_v13 = vand.u32 2147483647, %v546_v10  ;;  %vm81_vm13 = vcmp.lt.s32.totalorder %v546_v10, 0 }
  0x1e   :  { %v83_v12 = vshrl.u32 %v82_v11, 23  ;;  %v86_v16 = vand.u32 8388607, %v79_v13  ;;  %vm80_vm14 = vcmp.le.f32.partialorder %v79_v13, 0.7853982 }
  0x20   :  { %v421_v14 = vadd.s32 4294967169, %v83_v12  ;;  %v87_v19 = vor.u32 8388608, %v86_v16  ;;  %v517_v12 = vmov 0  }
  0x22   :  { %v89_v15 = vadd.s32 1, %v421_v14  ;;  %v555_v41 = vshll.u32 %v87_v19, 8 }
  0x24   :  { %vm90_vm0 = vcmp.gt.s32.totalorder %v89_v15, 0  ;;  %v128_v50 = vand.u32 65535, %v555_v41  ;;  %v129_v51 = vshrl.u32 %v555_v41, 16 }
  0x25   :  { %v91_v17 = vsel %vm90_vm0, %v89_v15, 0 }
  0x26   :  { %v93_v18 = vand.u32 31, %v91_v17  ;;  %v552_v20 = vshrl.u32 %v91_v17, 5 }
  0x28   :  { %v94_v21 = vsub.s32 32, %v93_v18  ;;  %v96_v23 = vshll.u32 %v511_v22, %v93_v18  ;;  %v99_v25 = vshll.u32 %v512_v24, %v93_v18  ;;  %v102_v27 = vshll.u32 %v513_v26, %v93_v18 }
  0x29   :  { %v105_v29 = vshll.u32 %v514_v28, %v93_v18  ;;  %v108_v31 = vshll.u32 %v515_v30, %v93_v18  ;;  %vm111_vm1 = vcmp.lt.s32.totalorder %v552_v20, 1  ;;  %vm113_vm2 = vcmp.lt.s32.totalorder %v552_v20, 3 }
  0x2a   :  { %v97_v32 = vshrl.u32 %v512_v24, %v94_v21  ;;  %v100_v33 = vshrl.u32 %v513_v26, %v94_v21  ;;  %v103_v34 = vshrl.u32 %v514_v28, %v94_v21  ;;  %v106_v35 = vshrl.u32 %v515_v30, %v94_v21 }
  0x2b   :  { %v109_v37 = vshrl.u32 %v516_v36, %v94_v21  ;;  %vm114_vm3 = vcmp.lt.s32.totalorder %v552_v20, 4  ;;  %vm112_vm4 = vcmp.lt.s32.totalorder %v552_v20, 2  ;;  %v95_v58 = vshrl.u32 %v511_v22, %v94_v21  ;;  %v587_v36 = vld [vmem:[#allocation6] sm:$0x1] }
  0x2c   :  { %v98_v38 = vor.u32 %v97_v32, %v96_v23  ;;  %v101_v39 = vor.u32 %v100_v33, %v99_v25  ;;  %v104_v40 = vor.u32 %v103_v34, %v102_v27  ;;  %v107_v42 = vor.u32 %v106_v35, %v105_v29 }
  0x2d   :  { %v110_v43 = vor.u32 %v109_v37, %v108_v31 }
  0x2e   :  { %v119_v44 = vsel %vm111_vm1, %v98_v38, %v101_v39  ;;  %v123_v45 = vsel %vm111_vm1, %v101_v39, %v104_v40  ;;  %v120_v46 = vsel %vm114_vm3, %v107_v42, 920167782  ;;  %v115_v8 = vsel %vm111_vm1, %v95_v58, %v98_v38 }
  0x2f   :  { %v124_v47 = vsel %vm114_vm3, %v110_v43, 1326507024  ;;  %v121_v48 = vsel %vm113_vm2, %v104_v40, %v120_v46  ;;  %v116_v11 = vsel %vm114_vm3, %v104_v40, 2102212464  ;;  %v60_v40 = vmul.f32 %v543_v1, %v543_v1 }
  0x30   :  { %v125_v49 = vsel %vm113_vm2, %v107_v42, %v124_v47  ;;  %v122_v52 = vsel %vm112_vm4, %v119_v44, %v121_v48  ;;  %v117_v23 = vsel %vm113_vm2, %v101_v39, %v116_v11  ;;  %v59_v39 = vmul.f32 %v587_v36, %v587_v36 }
  0x31   :  { %v126_v53 = vsel %vm112_vm4, %v123_v45, %v125_v49  ;;  %v152_v56 = vand.u32 65535, %v122_v52  ;;  %v153_v57 = vshrl.u32 %v122_v52, 16  ;;  %v118_v31 = vsel %vm112_vm4, %v115_v8, %v117_v23 }
  0x32   :  { %v130_v54 = vand.u32 65535, %v126_v53  ;;  %v131_v55 = vshrl.u32 %v126_v53, 16  ;;  %v172_v35 = vmul.u32 %v555_v41, %v118_v31  ;;  %v593_v20 = vadd.f32 %v60_v40, %v59_v39 }
  0x33   :  { %v154_v62 = vmul.u32 %v152_v56, %v128_v50  ;;  %v155_v63 = vmul.u32 %v153_v57, %v128_v50  ;;  %v156_v0 = vmul.u32 %v152_v56, %v129_v51  ;;  %v157_v5 = vmul.u32 %v153_v57, %v129_v51 }
  0x34   :  { %v132_v59 = vmul.u32 %v130_v54, %v128_v50  ;;  %v133_v60 = vmul.u32 %v131_v55, %v128_v50  ;;  %v134_v61 = vmul.u32 %v130_v54, %v129_v51  ;;  %v135_v2 = vmul.u32 %v131_v55, %v129_v51 }
  0x35   :  { %v158_v6 = vshll.u32 %v155_v63, 16  ;;  %v160_v7 = vshll.u32 %v156_v0, 16  ;;  %v159_v21 = vshrl.u32 %v155_v63, 16  ;;  %v161_v27 = vshrl.u32 %v156_v0, 16 }
  0x36   :  { %v136_v3 = vshll.u32 %v133_v60, 16  ;;  %v138_v4 = vshll.u32 %v134_v61, 16  ;;  %v137_v16 = vshrl.u32 %v133_v60, 16  ;;  %v139_v24 = vshrl.u32 %v134_v61, 16 }
  0x37   :  { %vm162_vm6 = vc.u32 %v154_v62, %v158_v6  ;;  %v164_v15 = vadd.s32 %v158_v6, %v154_v62  ;;  %vm62_vm10 = vcmp.gt.f32.partialorder %v593_v20, 0.0 }
  0x38   :  { %vm140_vm5 = vc.u32 %v132_v59, %v136_v3  ;;  %v142_v9 = vadd.s32 %v136_v3, %v132_v59  ;;  %v163_v18 = vsel %vm162_vm6, 1, %v517_v12  ;;  %v63_v47 = vsel %vm62_vm10, %v593_v20, 1.0 }
  0x39   :  { %v141_v14 = vsel %vm140_vm5, 1, %v517_v12  ;;  %v165_v22 = vadd.s32 %v163_v18, %v157_v5  ;;  %vm166_vm8 = vc.u32 %v164_v15, %v160_v7  ;;  %v168_v30 = vadd.s32 %v164_v15, %v160_v7 }
  0x3a   :  { %v143_v17 = vadd.s32 %v141_v14, %v135_v2  ;;  %vm144_vm7 = vc.u32 %v142_v9, %v138_v4  ;;  %v167_v26 = vsel %vm166_vm8, 1, %v517_v12  ;;  %439 = vrsqrt.f32 %v63_v47 }
  0x3b   :  { %v145_v19 = vsel %vm144_vm7, 1, %v517_v12  ;;  %v169_v28 = vadd.s32 %v167_v26, %v165_v22  ;;  %vm70_vm15 = vweird.f32 %v63_v47  ;;  %vm222_vm8 = vweird.f32 %v546_v10 }
  0x3c   :  { %v147_v25 = vadd.s32 %v145_v19, %v143_v17 }
  0x3d   :  { %v170_v32 = vadd.s32 %v169_v28, %v159_v21 }
  0x3e   :  { %v148_v29 = vadd.s32 %v147_v25, %v137_v16 }
  0x3f   :  { %v171_v34 = vadd.s32 %v170_v32, %v161_v27 }
  0x40   :  { %v149_v33 = vadd.s32 %v148_v29, %v139_v24  ;;  %v440_v56 = vpop.eup %439 }
  0x41   :  { %v175_v37 = vadd.s32 1, %v171_v34  ;;  %v65_v59 = vmul.f32 %v440_v56, %v63_v47  ;;  %vm71_vm0 = vweird.f32 %v440_v56 }
  0x42   :  { %vm174_vm9 = vc.u32 %v149_v33, %v168_v30  ;;  %v173_v51 = vadd.s32 %v168_v30, %v149_v33  ;;  %vm72_vm1 = vmor %vm70_vm15, %vm71_vm0 }
  0x43   :  { %v176_v38 = vsel %vm174_vm9, %v175_v37, %v171_v34  ;;  %v66_v0 = vmul.f32 %v440_v56, %v65_v59 }
  0x44   :  { %v177_v42 = vadd.s32 %v176_v38, %v172_v35 }
  0x45   :  { %v67_v5 = vmul.f32 0.5, %v66_v0 }
  0x46   :  { %v178_v43 = vadd.s32 536870912, %v177_v42 }
  0x47   :  { %v68_v11 = vsub.f32 1.5, %v67_v5 }
  0x48   :  { %v179_v44 = vshrl.u32 %v178_v43, 30 }
  0x49   :  { %v69_v17 = vmul.f32 %v440_v56, %v68_v11 }
  0x4a   :  { %v180_v45 = vshll.u32 %v179_v44, 30  ;;  %v203_v4 = vsub.s32 4, %v179_v44 }
  0x4b   :  { %v73_v13 = vsel %vm72_vm1, %v440_v56, %v69_v17 }
  0x4c   :  { %v181_v41 = vsub.s32 %v177_v42, %v180_v45  ;;  %v204_v8 = vsel %vm81_vm13, %v203_v4, %v179_v44  ;;  %v74_v30 = vsel %vm62_vm10, %v73_v13, 0.0 }
  0x4d   :  { %v206_v14 = vsel %vm80_vm14, 0, %v204_v8  ;;  %v75_v33 = vmul.f32 %v74_v30, %v587_v36  ;;  %v77_v34 = vmul.f32 %v74_v30, %v543_v1 }
  0x4e   :  { %vm182_vm11 = vcmp.lt.s32.totalorder %v181_v41, 0  ;;  %v183_v46 = vsub.s32 0, %v181_v41  ;;  %v377_v21 = vadd.s32 3, %v206_v14  ;;  %v223_v26 = vand.u32 3, %v206_v14 }
  0x4f   :  { %v76_v42 = vsel %vm62_vm10, %v75_v33, 1.0  ;;  %v78_v43 = vsel %vm62_vm10, %v77_v34, 0.0 }
  0x50   :  { %v184_v48 = vsel %vm182_vm11, %v183_v46, %v181_v41  ;;  %v378_v27 = vand.u32 3, %v377_v21  ;;  %vm228_vm2 = vcmp.eq.s32.totalorder %v223_v26, 2  ;;  %vm224_vm4 = vcmp.lt.s32.totalorder %v223_v26, 2 }
  0x51   :  { %v185_v49 = vclz %v184_v48  ;;  %vm225_vm5 = vcmp.eq.s32.totalorder %v223_v26, 0 }
  0x52   :  { %vm383_vm3 = vcmp.eq.s32.totalorder %v378_v27, 2  ;;  %vm380_vm6 = vcmp.eq.s32.totalorder %v378_v27, 0  ;;  %vm379_vm7 = vcmp.lt.s32.totalorder %v378_v27, 2 }
  0x53   :  { %v422_v50 = vadd.s32 4294967294, %v185_v49 }
  0x55   :  { %vm423_vm12 = vcmp.lt.s32.totalorder %v422_v50, 0 }
  0x56   :  { %v188_v52 = vsel %vm423_vm12, 0, %v422_v50 }
  0x57   :  { %v189_v53 = vsub.s32 32, %v188_v52  ;;  %v190_v54 = vshll.u32 %v181_v41, %v188_v52  ;;  %v193_v55 = vsub.s32 4294967266, %v188_v52 }
  0x59   :  { %v191_v57 = vshrl.u32 %v173_v51, %v189_v53  ;;  %v194_v58 = vadd.s32 127, %v193_v55 }
  0x5b   :  { %v192_v60 = vor.u32 %v191_v57, %v190_v54  ;;  %v195_v61 = vshll.u32 %v194_v58, 23 }
  0x5d   :  { %v196_v62 = vor.u32 4788187, %v195_v61  ;;  %v199_v63 = vcvt.s32.f32 %v192_v60 }
  0x5f   :  { %v197_v2 = vand.u32 2147483647, %v196_v62 }
  0x61   :  { %v200_v3 = vmul.f32 %v199_v63, %v197_v2 }
  0x63   :  { %v201_v6 = vxor.u32 2147483648, %v200_v3 }
  0x65   :  { %v202_v7 = vsel %vm81_vm13, %v201_v6, %v200_v3 }
  0x66   :  { %v205_v9 = vsel %vm80_vm14, %v546_v10, %v202_v7 }
  0x67   :  { %v207_v12 = vmul.f32 %v205_v9, %v205_v9 }
  0x69   :  { %v208_v15 = vmul.f32 -0.001358992, %v207_v12  ;;  %v215_v16 = vmul.f32 -0.00019511016, %v207_v12 }
  0x6b   :  { %v209_v18 = vadd.f32 0.041655596, %v208_v15  ;;  %v216_v19 = vadd.f32 0.008332121, %v215_v16 }
  0x6d   :  { %v210_v22 = vmul.f32 %v209_v18, %v207_v12  ;;  %v217_v23 = vmul.f32 %v216_v19, %v207_v12 }
  0x6f   :  { %v211_v24 = vadd.f32 -0.4999988, %v210_v22  ;;  %v218_v25 = vadd.f32 -0.16666654, %v217_v23 }
  0x71   :  { %v212_v28 = vmul.f32 %v211_v24, %v207_v12  ;;  %v219_v29 = vmul.f32 %v218_v25, %v207_v12 }
  0x73   :  { %v213_v31 = vadd.f32 1.0, %v212_v28  ;;  %v220_v32 = vadd.f32 1.0, %v219_v29 }
  0x75   :  { %v221_v35 = vmul.f32 %v220_v32, %v205_v9  ;;  %v229_v37 = vxor.u32 2147483648, %v213_v31 }
  0x77   :  { %v226_v38 = vxor.u32 2147483648, %v221_v35  ;;  %v230_v39 = vsel %vm228_vm2, %v229_v37, %v221_v35  ;;  %v385_v40 = vsel %vm383_vm3, %v229_v37, %v221_v35 }
  0x79   :  { %v227_v36 = vsel %vm225_vm5, %v213_v31, %v226_v38  ;;  %v382_v44 = vsel %vm380_vm6, %v213_v31, %v226_v38 }
  0x7a   :  { %v231_v1 = vsel %vm224_vm4, %v227_v36, %v230_v39  ;;  %v386_v45 = vsel %vm379_vm7, %v382_v44, %v385_v40 }
  0x7b   :  { %v232_v41 = vsel %vm222_vm8, nan, %v231_v1  ;;  %v387_v46 = vsel %vm222_vm8, nan, %v386_v45 }
  0x7c   :  { %v388_v47 = vmul.f32 %v232_v41, %v76_v42  ;;  %v389_v48 = vmul.f32 %v387_v46, %v78_v43  ;;  %v391_v49 = vmul.f32 %v232_v41, %v78_v43  ;;  %v392_v50 = vmul.f32 %v387_v46, %v76_v42 }
  0x7e   :  { %v390_v10 = vsub.f32 %v388_v47, %v389_v48  ;;  %v393_v51 = vadd.f32 %v392_v50, %v391_v49 }
  0x80   :  { %394 = vst [vmem:[#allocation7] sm:$0x1] %v390_v10 }
  0x81   :  { %396 = vst [vmem:[#allocation7 + $0x1] sm:$0x1] %v393_v51 }
  0x82   :  { %411 = dma.vmem_to_hbm [thread:$0]  %s404_s21, 48, %s406_s24, [#allocation4], %s509_s18, %s509_s18, %s510_s19  }
  0x83   :  { %505 = dma.done.wait [#allocation4], 48  }
  0x84   :  { %506 = vsyncadd [#allocation4], 4294967248 }
  0x85   :  { %416 = vsyncpa [#allocation3], 1 }
  0x86   :  { %417 = vsyncpa [#allocation4], 1 }
  0x87   :  { %418 = vsyncpa [#allocation5], 1 }

</bundles_post_ra>
